<compile_context>
chip_gen: v7x
topology: tpu7x:2x2x1
jax: 0.10.0
libtpu: 0.0.40
codegen_flags: <defaults>
</compile_context>

<pallas_src>
import math

import numpy as np
import jax
import jax.numpy as jnp
from jax.experimental import pallas as pl
from jax.experimental.pallas import tpu as pltpu


def _make_kernel(r):
    """Kernel over rows of width W: o = sin(sum_i t[:, i] * F[i, :] + phase)."""

    def kernel(t_ref, f_ref, p_ref, o_ref):
        # t_ref: (tile, r)   packed time values (r timesteps per output row)
        # f_ref: (r, W)      frequency rows, disjoint lane support per i (resident)
        # p_ref: (1, W)      phase row: 0 for the sin half, pi/2 for the cos half
        # o_ref: (tile, W)   lane-dense output tile
        t = t_ref[...]
        f = f_ref[...]
        args = p_ref[...] + t[:, 0:1] * f[0:1, :]
        for i in range(1, r):                      # exact f32 expansion on the VPU
            args = args + t[:, i : i + 1] * f[i : i + 1, :]
        o_ref[...] = jnp.sin(args).astype(o_ref.dtype)

    return kernel


def _pick_tile(n_rows, row_bytes, *, budget_bytes=4 << 20):
    """Rows per grid step: multiple of 8, <= ~4 MiB per output tile (safe for
    double-buffering on every TPU generation), and >= 2 grid steps when n_rows
    allows so v7x megacore ("parallel") actually engages."""
    if n_rows < 16:
        return n_rows                              # single full-extent block
    cap = max(8, ((budget_bytes // row_bytes) // 8) * 8)
    return max(8, min(8 * pl.cdiv(n_rows, 16), cap))


def sinusoidal_position_embeddings(time, dim, *, out_dtype=jnp.float32):
    """out[b] = [sin(time[b]*freqs), cos(time[b]*freqs)].  time: (B,), returns (B, dim)."""
    assert dim % 2 == 0 and dim >= 4, "dim must be even and >= 4 (dim==2 divides by zero, as in torch)"
    half = dim // 2
    B = int(time.shape[0])

    # Trace-time constants (same math as the torch module).
    scale = math.log(10000.0) / (half - 1)
    f = np.exp(np.arange(half, dtype=np.float32) * np.float32(-scale)).astype(np.float32)
    f_full = np.concatenate([f, f]).astype(np.float32)                       # freqs for [sin | cos]
    phase = np.concatenate(
        [np.zeros(half, np.float32), np.full(half, np.pi / 2, np.float32)])  # cos(x) = sin(x + pi/2)

    # Lane-dense packing: when dim < 128 and divides 128 (and B*dim is a multiple of
    # 128), view the contiguous (B, dim) output as (B*dim/128, 128) -> full-width stores.
    if dim < 128 and 128 % dim == 0 and (B * dim) % 128 == 0:
        r, W = 128 // dim, 128
    else:
        r, W = 1, dim
    rows = (B * dim) // W

    # Frequency rows with disjoint lane support: F[i, i*dim + c] = f_full[c].
    F = np.zeros((r, W), np.float32)
    for i in range(r):
        F[i, i * dim : (i + 1) * dim] = f_full
    P = np.tile(phase, r).reshape(1, W)

    t2 = time.astype(jnp.float32).reshape(rows, r)

    tile = _pick_tile(rows, W * 4)
    grid = (pl.cdiv(rows, tile),)

    cost = pl.CostEstimate(
        flops=2 * r * rows * W,          # broadcast-mul/add expansion
        transcendentals=B * dim,         # one fused sin per output element
        bytes_accessed=(B + (r + 1) * W + B * dim) * 4,
    )

    out = pl.pallas_call(
        _make_kernel(r),
        out_shape=jax.ShapeDtypeStruct((rows, W), out_dtype),
        grid=grid,
        in_specs=[
            pl.BlockSpec((tile, r), lambda i: (i, 0)),   # time tiles walk the batch
            pl.BlockSpec((r, W), lambda i: (0, 0)),      # freqs: VMEM-resident across steps
            pl.BlockSpec((1, W), lambda i: (0, 0)),      # phase: VMEM-resident across steps
        ],
        out_specs=pl.BlockSpec((tile, W), lambda i: (i, 0)),
        compiler_params=pltpu.CompilerParams(
            dimension_semantics=("parallel",),           # rows independent -> v7x megacore
        ),
        cost_estimate=cost,
    )(t2, jnp.asarray(F), jnp.asarray(P))

    return out.reshape(B, dim)                           # free view of the contiguous buffer


class SinusoidalPositionEmbeddings:
    """JAX/Pallas mirror of the PyTorch module."""

    def __init__(self, dim):
        self.dim = dim

    def __call__(self, time):
        return sinusoidal_position_embeddings(time, self.dim)


def _reference(time, dim):
    half = dim // 2
    scale = math.log(10000.0) / (half - 1)
    freqs = jnp.exp(jnp.arange(half, dtype=jnp.float32) * -scale)
    args = time[:, None] * freqs[None, :]
    return jnp.concatenate([jnp.sin(args), jnp.cos(args)], axis=-1)


if __name__ == "__main__":
    key = jax.random.PRNGKey(0)

    # (B, dim) cases: lane-packed path (dim < 128), general path (dim >= 128),
    # multi-step grid with a partial last tile, and a dim not divisible by 128.
    cases = [(8, 32), (8, 256), (80, 32), (80, 192)]

    for B, dim in cases:
        kb = jax.random.fold_in(key, B * 1000 + dim)
        t = jax.random.randint(kb, (B,), 0, 1000).astype(jnp.float32)

        out = SinusoidalPositionEmbeddings(dim)(t)
        jax.block_until_ready(out)

        ref = _reference(t, dim)
        assert out.shape == (B, dim), f"bad shape for B={B}, dim={dim}"
        assert jnp.allclose(out, ref, atol=1e-3, rtol=1e-3), f"mismatch vs reference (B={B}, dim={dim})"

    print("KERNEL_OK")
</pallas_src>

<mosaic_0001>
module attributes {stable_mosaic.version = 11 : i64} {
  func.func @kernel(%arg0: i32, %arg1: memref<2x4xf32, #tpu.memory_space<vmem>>, %arg2: memref<4x128xf32, #tpu.memory_space<vmem>>, %arg3: memref<1x128xf32, #tpu.memory_space<vmem>>, %arg4: memref<2x128xf32, #tpu.memory_space<vmem>>) attributes {dimension_semantics = [#tpu.dimension_semantics<parallel>], iteration_bounds = array<i64: 1>, scalar_prefetch = 0 : i64, scratch_operands = 0 : i64, tpu.core_type = #tpu.core_type<tc>, window_params = [{transform_indices = @transform_0, window_bounds = array<i64: 2, 4>}, {pipeline_mode = #tpu.pipeline_mode<synchronous>, transform_indices = @transform_1, window_bounds = array<i64: 4, 128>}, {pipeline_mode = #tpu.pipeline_mode<synchronous>, transform_indices = @transform_2, window_bounds = array<i64: 1, 128>}, {transform_indices = @transform_3, window_bounds = array<i64: 2, 128>}]} {
    %c0 = arith.constant 0 : index
    %c0_0 = arith.constant 0 : index
    %0 = vector.load %arg1[%c0, %c0_0] : memref<2x4xf32, #tpu.memory_space<vmem>>, vector<2x4xf32>
    %c0_1 = arith.constant 0 : index
    %c0_2 = arith.constant 0 : index
    %1 = vector.load %arg2[%c0_1, %c0_2] : memref<4x128xf32, #tpu.memory_space<vmem>>, vector<4x128xf32>
    %c0_3 = arith.constant 0 : index
    %c0_4 = arith.constant 0 : index
    %2 = vector.load %arg3[%c0_3, %c0_4] : memref<1x128xf32, #tpu.memory_space<vmem>>, vector<1x128xf32>
    %3 = vector.extract_strided_slice %0 {offsets = [0, 0], sizes = [2, 1], strides = [1, 1]} : vector<2x4xf32> to vector<2x1xf32>
    %4 = vector.extract_strided_slice %1 {offsets = [0, 0], sizes = [1, 128], strides = [1, 1]} : vector<4x128xf32> to vector<1x128xf32>
    %5 = vector.broadcast %3 : vector<2x1xf32> to vector<2x128xf32>
    %6 = vector.broadcast %4 : vector<1x128xf32> to vector<2x128xf32>
    %7 = arith.mulf %5, %6 : vector<2x128xf32>
    %8 = vector.broadcast %2 : vector<1x128xf32> to vector<2x128xf32>
    %9 = arith.addf %8, %7 : vector<2x128xf32>
    %10 = vector.extract_strided_slice %0 {offsets = [0, 1], sizes = [2, 1], strides = [1, 1]} : vector<2x4xf32> to vector<2x1xf32>
    %11 = vector.extract_strided_slice %1 {offsets = [1, 0], sizes = [1, 128], strides = [1, 1]} : vector<4x128xf32> to vector<1x128xf32>
    %12 = vector.broadcast %10 : vector<2x1xf32> to vector<2x128xf32>
    %13 = vector.broadcast %11 : vector<1x128xf32> to vector<2x128xf32>
    %14 = arith.mulf %12, %13 : vector<2x128xf32>
    %15 = arith.addf %9, %14 : vector<2x128xf32>
    %16 = vector.extract_strided_slice %0 {offsets = [0, 2], sizes = [2, 1], strides = [1, 1]} : vector<2x4xf32> to vector<2x1xf32>
    %17 = vector.extract_strided_slice %1 {offsets = [2, 0], sizes = [1, 128], strides = [1, 1]} : vector<4x128xf32> to vector<1x128xf32>
    %18 = vector.broadcast %16 : vector<2x1xf32> to vector<2x128xf32>
    %19 = vector.broadcast %17 : vector<1x128xf32> to vector<2x128xf32>
    %20 = arith.mulf %18, %19 : vector<2x128xf32>
    %21 = arith.addf %15, %20 : vector<2x128xf32>
    %22 = vector.extract_strided_slice %0 {offsets = [0, 3], sizes = [2, 1], strides = [1, 1]} : vector<2x4xf32> to vector<2x1xf32>
    %23 = vector.extract_strided_slice %1 {offsets = [3, 0], sizes = [1, 128], strides = [1, 1]} : vector<4x128xf32> to vector<1x128xf32>
    %24 = vector.broadcast %22 : vector<2x1xf32> to vector<2x128xf32>
    %25 = vector.broadcast %23 : vector<1x128xf32> to vector<2x128xf32>
    %26 = arith.mulf %24, %25 : vector<2x128xf32>
    %27 = arith.addf %21, %26 : vector<2x128xf32>
    %28 = math.sin %27 : vector<2x128xf32>
    %c0_5 = arith.constant 0 : index
    %c0_6 = arith.constant 0 : index
    %29 = vector.load %arg4[%c0_5, %c0_6] : memref<2x128xf32, #tpu.memory_space<vmem>>, vector<2x128xf32>
    tpu.vector_store %arg4[%c0_5, %c0_6], %28 {strides = array<i32>} : memref<2x128xf32, #tpu.memory_space<vmem>>, vector<2x128xf32>,
    return
  }
  func.func @transform_0(%arg0: i32) -> (i32, i32) {
    %c0_i32 = arith.constant 0 : i32
    %c0_i32_0 = arith.constant 0 : i32
    return %arg0, %c0_i32 : i32, i32
  }
  func.func @transform_1(%arg0: i32) -> (i32, i32) {
    %c0_i32 = arith.constant 0 : i32
    %c0_i32_0 = arith.constant 0 : i32
    %c0_i32_1 = arith.constant 0 : i32
    return %c0_i32, %c0_i32_0 : i32, i32
  }
  func.func @transform_2(%arg0: i32) -> (i32, i32) {
    %c0_i32 = arith.constant 0 : i32
    %c0_i32_0 = arith.constant 0 : i32
    %c0_i32_1 = arith.constant 0 : i32
    return %c0_i32, %c0_i32_0 : i32, i32
  }
  func.func @transform_3(%arg0: i32) -> (i32, i32) {
    %c0_i32 = arith.constant 0 : i32
    %c0_i32_0 = arith.constant 0 : i32
    return %arg0, %c0_i32 : i32, i32
  }
}

</mosaic_0001>

<bundles_post_ra>
// kernel: tpu_custom_call.1
= control target key start
LH: loop header
LB: loop body
LE: loop exit
PB: predicated region body
PF: predicated region fallthrough
CT: control target
= control target key end

     0   :  { %8 = vsyncpa [#allocation3], 0  ;;  %s406_s0 = inlined_call_operand.hbm [shape: f32[2,4], index: 0, kind: input, shape index: {}]   ;;  %s407_s1 = inlined_call_operand.hbm [shape: f32[4,128], index: 1, kind: input, shape index: {}]   ;;  %s408_s2 = inlined_call_operand.vmem [shape: f32[1,128], index: 2, kind: input, shape index: {}]   ;;  %s409_s3 = inlined_call_operand.hbm [shape: f32[2,128], index: 3, kind: output, shape index: {}]  }
   0x1   :  { %9 = vsyncpa [#allocation6], 0 }
   0x2   :  { %10 = vsyncpa [#allocation4], 0  ;;  %s313_s12 = smov [#allocation2]   ;;  %s314_s14 = smov [#allocation5]  }
   0x3   :  { %s17_s13 = sshll.u32 %s313_s12, 4  ;;  %s27_s15 = sshll.u32 %s314_s14, 4  ;;  %s18_s13 = int_to_ptr.vmem [resolvable:$true] %s17_s13  ;;  %s28_s15 = int_to_ptr.vmem [resolvable:$true] %s27_s15 }
   0x4   :  { %s241_s18 = scalar_lea.hbm %s406_s0, 32 }
   0x5   :  { %p242_p0 = scmp.ne.s32.totalorder %s406_s0, %s241_s18  ;;  %p245_p1 = scmp.lt.u32.totalorder %s241_s18, %s406_s0 }
   0x7   :  { %p247_p2 = pnand %p245_p1, %p242_p0 }
   0x9   :  { %250 = shalt.err (!%p247_p2)
}
   0xa   :  { %s251_s23 = scalar_lea.vmem %s18_s13, 32  ;;  %p256_p4 = scmp.lt.s32.totalorder %s18_s13, %s18_s13 }
   0xb   :  { %p252_p3 = scmp.ne.s32.totalorder %s18_s13, %s251_s23  ;;  %p257_p5 = scmp.lt.s32.totalorder %s251_s23, %s251_s23 }
   0xd   :  { %p258_p6 = por %p257_p5, %p256_p4 }
   0xf   :  { %p259_p7 = pnand %p258_p6, %p252_p3 }
  0x11   :  { %262 = shalt.err (!%p259_p7)
}
  0x12   :  { %20 = dma.hbm_to_vmem [thread:$0]  %s406_s0, 32, %s18_s13, [#allocation3]  }
  0x13   :  { %s263_s28 = scalar_lea.hbm %s407_s1, 64 }
  0x14   :  { %p264_p8 = scmp.ne.s32.totalorder %s407_s1, %s263_s28  ;;  %p267_p9 = scmp.lt.u32.totalorder %s263_s28, %s407_s1 }
  0x16   :  { %p269_p10 = pnand %p267_p9, %p264_p8 }
  0x18   :  { %272 = shalt.err (!%p269_p10)
}
  0x19   :  { %s273_s6 = scalar_lea.vmem %s28_s15, 64  ;;  %p278_p12 = scmp.lt.s32.totalorder %s28_s15, %s28_s15 }
  0x1a   :  { %p274_p11 = scmp.ne.s32.totalorder %s28_s15, %s273_s6  ;;  %p279_p13 = scmp.lt.s32.totalorder %s273_s6, %s273_s6 }
  0x1c   :  { %p280_p0 = por %p279_p13, %p278_p12 }
  0x1e   :  { %p281_p1 = pnand %p280_p0, %p274_p11 }
  0x20   :  { %284 = shalt.err (!%p281_p1)
}
  0x21   :  { %30 = dma.hbm_to_vmem [thread:$0]  %s407_s1, 64, %s28_s15, [#allocation6]  }
  0x22   :  { %307 = dma.done.wait [#allocation3], 32  }
  0x23   :  { %308 = vsyncadd [#allocation3], 4294967264 }
  0x24   :  { %309 = dma.done.wait [#allocation6], 64  }
  0x25   :  { %310 = vsyncadd [#allocation6], 4294967232  ;;  %v315_v0 = vmov 0   ;;  %v316_v1 = vmov 2   ;;  %v39_v2 = vld [vmem:[#allocation2] sm:$0x3]  ;;  %v47_v5 = vlaneseq }
  0x26   :  { %232 = vset.pattern.permute.xlu0 %v315_v0  ;;  %234 = vset.pattern.permute.xlu1 %v316_v1  ;;  %v317_v3 = vmov 1   ;;  %v318_v4 = vmov 3   ;;  %v40_v8 = vld [vmem:[#allocation5] sm:$0xf]  ;;  %v210_v17 = vld [vmem:[%s408_s2] ss:$0 sm:$0xff] }
  0x27   :  { %44 = vperm.xlu0 %232, %v39_v2   ;;  %70 = vperm.xlu1 %234, %v39_v2   ;;  %v48_v6 = vshrl.u32 %v47_v5, 7  ;;  %v319_v40 = vmov 2102212464   ;;  %v320_v42 = vmov 920167782   ;;  %s325_s2 = smov [#allocation7]  }
  0x28   :  { %v321_v46 = vmov 1326507024   ;;  %v322_v48 = vmov 683565275   ;;  %v323_v50 = vmov 2475754826  }
  0x29   :  { %v49_v7 = vsub.s32 0, %v48_v6  ;;  %v65_v10 = vsub.s32 1, %v48_v6  ;;  %v75_v12 = vsub.s32 2, %v48_v6  ;;  %v85_v14 = vsub.s32 3, %v48_v6  ;;  %s200_s9 = sshll.u32 %s325_s2, 4  ;;  %s201_s9 = int_to_ptr.vmem [resolvable:$true] %s200_s9 }
  0x2a   :  { %v324_v53 = vmov 2131351028   ;;  %s285_s10 = scalar_lea.vmem %s201_s9, 32  ;;  %p290_p3 = scmp.lt.s32.totalorder %s201_s9, %s201_s9 }
  0x2b   :  { %233 = vset.pattern.permute.xlu0 %v317_v3  ;;  %235 = vset.pattern.permute.xlu1 %v318_v4  ;;  %v50_v9 = vrot.slane %v40_v8, %v49_v7  ;;  %v66_v16 = vrot.slane %v40_v8, %v65_v10  ;;  %v76_v18 = vrot.slane %v40_v8, %v75_v12  ;;  %p286_p2 = scmp.ne.s32.totalorder %s201_s9, %s285_s10  ;;  %p291_p4 = scmp.lt.s32.totalorder %s285_s10, %s285_s10 }
  0x2c   :  { %60 = vperm.xlu0 %233, %v39_v2   ;;  %80 = vperm.xlu1 %235, %v39_v2   ;;  %v86_v19 = vrot.slane %v40_v8, %v85_v14 }
  0x2d   :  { %p292_p5 = por %p291_p4, %p290_p3 }
  0x2f   :  { %p293_p6 = pnand %p292_p5, %p286_p2 }
  0x30   :  { %236 = vset.pattern.permute.xlu0 %v318_v4 }
  0xa6   :  { %v45_v11 = vpop.permute.xlu0 %44  ;;  %v71_v13 = vpop.permute.xlu1 %70 }
  0xa7   :  { %v51_v15 = vmul.f32 %v50_v9, %v45_v11  ;;  %v77_v24 = vmul.f32 %v76_v18, %v71_v13 }
  0xa9   :  { %v58_v22 = vadd.f32 %v210_v17, %v51_v15 }
  0xab   :  { %v61_v20 = vpop.permute.xlu0 %60  ;;  %v81_v21 = vpop.permute.xlu1 %80 }
  0xac   :  { %v67_v23 = vmul.f32 %v66_v16, %v61_v20  ;;  %v87_v26 = vmul.f32 %v86_v19, %v81_v21 }
  0xae   :  { %v68_v25 = vadd.f32 %v67_v23, %v58_v22 }
  0xb0   :  { %v78_v27 = vadd.f32 %v77_v24, %v68_v25 }
  0xb2   :  { %v373_v28 = vadd.f32 %v87_v26, %v78_v27 }
  0xb4   :  { %v92_v29 = vand.u32 2139095040, %v373_v28  ;;  %v89_v30 = vand.u32 2147483647, %v373_v28  ;;  %vm91_vm7 = vcmp.lt.s32.totalorder %v373_v28, 0  ;;  %vm181_vm12 = vweird.f32 %v373_v28 }
  0xb6   :  { %v93_v31 = vshrl.u32 %v92_v29, 23  ;;  %v96_v33 = vand.u32 8388607, %v89_v30  ;;  %vm90_vm8 = vcmp.le.f32.partialorder %v89_v30, 0.7853982 }
  0xb8   :  { %v211_v32 = vadd.s32 4294967169, %v93_v31  ;;  %v97_v36 = vor.u32 8388608, %v96_v33 }
  0xba   :  { %v99_v34 = vadd.s32 1, %v211_v32  ;;  %v137_v44 = vshll.u32 %v97_v36, 8 }
  0xbc   :  { %vm100_vm0 = vcmp.gt.s32.totalorder %v99_v34, 0 }
  0xbd   :  { %v101_v35 = vsel %vm100_vm0, %v99_v34, 0 }
  0xbe   :  { %v103_v37 = vand.u32 31, %v101_v35  ;;  %v102_v38 = vshrl.u32 %v101_v35, 5 }
  0xc0   :  { %v104_v39 = vsub.s32 32, %v103_v37  ;;  %v115_v41 = vshll.u32 %v319_v40, %v103_v37  ;;  %v118_v43 = vshll.u32 %v320_v42, %v103_v37  ;;  %v106_v49 = vshll.u32 %v322_v48, %v103_v37 }
  0xc1   :  { %v109_v52 = vshll.u32 %v323_v50, %v103_v37  ;;  %v112_v55 = vshll.u32 %v324_v53, %v103_v37  ;;  %vm124_vm1 = vcmp.lt.s32.totalorder %v102_v38, 4  ;;  %vm121_vm2 = vcmp.lt.s32.totalorder %v102_v38, 1 }
  0xc2   :  { %v116_v45 = vshrl.u32 %v320_v42, %v104_v39  ;;  %v119_v47 = vshrl.u32 %v321_v46, %v104_v39  ;;  %v107_v51 = vshrl.u32 %v323_v50, %v104_v39  ;;  %v110_v54 = vshrl.u32 %v324_v53, %v104_v39 }
  0xc3   :  { %v113_v56 = vshrl.u32 %v319_v40, %v104_v39  ;;  %v105_v60 = vshrl.u32 %v322_v48, %v104_v39  ;;  %vm122_vm3 = vcmp.lt.s32.totalorder %v102_v38, 2  ;;  %vm123_vm4 = vcmp.lt.s32.totalorder %v102_v38, 3 }
  0xc4   :  { %v117_v57 = vor.u32 %v116_v45, %v115_v41  ;;  %v120_v58 = vor.u32 %v119_v47, %v118_v43  ;;  %v108_v59 = vor.u32 %v107_v51, %v106_v49  ;;  %v111_v61 = vor.u32 %v110_v54, %v109_v52 }
  0xc5   :  { %v114_v62 = vor.u32 %v113_v56, %v112_v55 }
  0xc6   :  { %v130_v63 = vsel %vm124_vm1, %v117_v57, 920167782  ;;  %v134_v0 = vsel %vm124_vm1, %v120_v58, 1326507024  ;;  %v129_v2 = vsel %vm121_vm2, %v108_v59, %v111_v61  ;;  %v125_v5 = vsel %vm121_vm2, %v105_v60, %v108_v59 }
  0xc7   :  { %v126_v1 = vsel %vm124_vm1, %v114_v62, 2102212464  ;;  %v131_v3 = vsel %vm123_vm4, %v114_v62, %v130_v63  ;;  %v133_v4 = vsel %vm121_vm2, %v111_v61, %v114_v62  ;;  %v135_v8 = vsel %vm123_vm4, %v117_v57, %v134_v0 }
  0xc8   :  { %v127_v6 = vsel %vm123_vm4, %v111_v61, %v126_v1  ;;  %v132_v7 = vsel %vm122_vm3, %v129_v2, %v131_v3  ;;  %v136_v9 = vsel %vm122_vm3, %v133_v4, %v135_v8 }
  0xc9   :  { %v379_v10 = vmul.u32.u64.low %v137_v44, %v132_v7  ;;  %v380_v11 = vmul.u32.u64.high %v137_v44, %v132_v7, %v379_v10  ;;  %v382_v12 = vmul.u32.u64.low %v137_v44, %v136_v9  ;;  %v383_v13 = vmul.u32.u64.high %v137_v44, %v136_v9, %v382_v12 }
  0xca   :  { %v128_v14 = vsel %vm122_vm3, %v125_v5, %v127_v6 }
  0xcb   :  { %v147_v15 = vadd.s32 1, %v380_v11  ;;  %v144_v16 = vmul.u32 %v137_v44, %v128_v14  ;;  %vm146_vm5 = vc.u32 %v383_v13, %v379_v10  ;;  %v145_v29 = vadd.s32 %v379_v10, %v383_v13 }
  0xcd   :  { %v148_v17 = vsel %vm146_vm5, %v147_v15, %v380_v11 }
  0xce   :  { %v149_v18 = vadd.s32 %v148_v17, %v144_v16 }
  0xd0   :  { %v150_v19 = vadd.s32 536870912, %v149_v18 }
  0xd2   :  { %v151_v20 = vshrl.u32 %v150_v19, 30 }
  0xd4   :  { %v152_v21 = vshll.u32 %v151_v20, 30  ;;  %v175_v42 = vsub.s32 4, %v151_v20 }
  0xd6   :  { %v153_v22 = vsub.s32 %v149_v18, %v152_v21  ;;  %v176_v45 = vsel %vm91_vm7, %v175_v42, %v151_v20 }
  0xd7   :  { %v178_v47 = vsel %vm90_vm8, 0, %v176_v45 }
  0xd8   :  { %v155_v23 = vsub.s32 0, %v153_v22  ;;  %v182_v48 = vadd.s32 3, %v178_v47 }
  0xda   :  { %v212_v24 = vmin.u32 %v155_v23, %v153_v22  ;;  %v183_v49 = vand.u32 3, %v182_v48 }
  0xdc   :  { %v157_v25 = vclz %v212_v24  ;;  %vm188_vm9 = vcmp.eq.s32.totalorder %v183_v49, 2  ;;  %vm185_vm10 = vcmp.eq.s32.totalorder %v183_v49, 0  ;;  %vm184_vm11 = vcmp.lt.s32.totalorder %v183_v49, 2 }
  0xde   :  { %v213_v26 = vadd.s32 4294967294, %v157_v25 }
  0xe0   :  { %vm214_vm6 = vcmp.lt.s32.totalorder %v213_v26, 0 }
  0xe1   :  { %v160_v27 = vsel %vm214_vm6, 0, %v213_v26 }
  0xe2   :  { %v161_v31 = vsub.s32 32, %v160_v27  ;;  %v165_v32 = vsub.s32 4294967266, %v160_v27  ;;  %v162_v33 = vshll.u32 %v153_v22, %v160_v27 }
  0xe4   :  { %v163_v34 = vshrl.u32 %v145_v29, %v161_v31  ;;  %v166_v35 = vadd.s32 127, %v165_v32 }
  0xe6   :  { %v164_v36 = vor.u32 %v163_v34, %v162_v33  ;;  %v167_v37 = vshll.u32 %v166_v35, 23 }
  0xe8   :  { %v168_v38 = vor.u32 4788187, %v167_v37  ;;  %v171_v40 = vcvt.s32.f32 %v164_v36 }
  0xea   :  { %v169_v39 = vand.u32 2147483647, %v168_v38 }
  0xec   :  { %v172_v41 = vmul.f32 %v171_v40, %v169_v39 }
  0xee   :  { %v173_v43 = vxor.u32 2147483648, %v172_v41 }
  0xf0   :  { %v174_v44 = vsel %vm91_vm7, %v173_v43, %v172_v41 }
  0xf1   :  { %v177_v46 = vsel %vm90_vm8, %v373_v28, %v174_v44 }
  0xf2   :  { %237 = vcosq.f32 %v177_v46 }
  0xf3   :  { %239 = vsinq.f32 %v177_v46 }
  0xfc   :  { %v238_v50 = vpop.eup %237 }
  0xfd   :  { %v240_v51 = vpop.eup %239  ;;  %v189_v52 = vxor.u32 2147483648, %v238_v50 }
  0xfe   :  { %v186_v53 = vxor.u32 2147483648, %v240_v51 }
  0xff   :  { %v190_v54 = vsel %vm188_vm9, %v189_v52, %v240_v51 }
 0x100   :  { %v187_v30 = vsel %vm185_vm10, %v238_v50, %v186_v53 }
 0x101   :  { %v191_v55 = vsel %vm184_vm11, %v187_v30, %v190_v54 }
 0x102   :  { %v192_v56 = vsel %vm181_vm12, nan, %v191_v55 }
 0x103   :  { %193 = vst [vmem:[#allocation7] sm:$0x3] %v192_v56 }
 0x104   :  { %296 = shalt.err (!%p293_p6)
}
 0x105   :  { %s297_s13 = scalar_lea.hbm %s409_s3, 32 }
 0x106   :  { %p298_p7 = scmp.ne.s32.totalorder %s409_s3, %s297_s13  ;;  %p301_p8 = scmp.lt.u32.totalorder %s297_s13, %s409_s3 }
 0x108   :  { %p303_p9 = pnand %p301_p8, %p298_p7 }
 0x10a   :  { %306 = shalt.err (!%p303_p9)
}
 0x10b   :  { %203 = dma.vmem_to_hbm [thread:$0]  %s201_s9, 32, %s409_s3, [#allocation4]  }
 0x10c   :  { %311 = dma.done.wait [#allocation4], 32  }
 0x10d   :  { %312 = vsyncadd [#allocation4], 4294967264 }
 0x10e   :  { %207 = vsyncpa [#allocation3], 1 }
 0x10f   :  { %208 = vsyncpa [#allocation6], 1 }
 0x110   :  { %209 = vsyncpa [#allocation4], 1 }

</bundles_post_ra>
